<compile_context>
chip_gen: v7x
topology: tpu7x:2x2x1
jax: 0.10.0
libtpu: 0.0.40
codegen_flags: <defaults>
</compile_context>

<pallas_src>
import jax
import jax.numpy as jnp
from jax import lax
from jax.experimental import pallas as pl
from jax.experimental.pallas import tpu as pltpu

# ----------------------------- model hyper-params ---------------------------
BATCH_IMG = 8                       # image batch
BATCH_TXT = 8                       # text batch
IMG_C, IMG_H, IMG_W = 3, 16, 16
PIX_FLAT = IMG_C * IMG_H * IMG_W    # 768
VISION_HIDDEN = 128                 # vision backbone hidden_size
TEXT_HIDDEN = 64                    # text backbone hidden_size
SEQ_LEN = 8
TOKENS = BATCH_TXT * SEQ_LEN        # 64 flattened tokens
VOCAB = 32
EMB_ROWS = VOCAB + 2                # token rows + 2 token-type rows (type_emb folded in)
NUM_TEXT_LAYERS = 6                 # => hidden_states = embeddings + 6 layers; max_cls_depth = 6
PROJ_DIM = 128                      # projection_dim == sentence_vector_size (512 in real model)
LOGITS_PAD = 128                    # lane-dense padded width of the logits outputs
MISC_ROWS = NUM_TEXT_LAYERS + 2     # rows 0..5: [scale|shift], row 6: output bias, row 7: logit_scale
NORM_EPS = 1e-12                    # guards all-zero feature rows (NaN-free normalisation)


# ------------------------------ fused Pallas kernel --------------------------
def _clip_fused_kernel(pix_ref,      # (Bi, 768)  f32 : flattened pixel_values
                       tok_ref,      # (TOKENS,3) i32 : [input_ids | token_type_ids | attention_mask]
                       emb_ref,      # (VOCAB+2, H) bf16 : token emb rows 0..V-1, type emb rows V..V+1
                       misc_ref,     # (8, 128)   f32 : rows 0..5 [layer scale|shift], row6 bias, row7 lane0 logit_scale
                       wpool_ref,    # (768, 128) bf16 : synthetic vision pool weight   (K,N layout)
                       wvis_ref,     # (128, 128) bf16 : visual_projection.weight.T     (K,N layout)
                       wout_ref,     # (384, 128) bf16 : output_linear.weight.T, depth-ordered chunks
                       li_ref,       # out (Bi, 128) f32
                       lt_ref):      # out (Bt, 128) f32
    f32 = jnp.float32
    bf16 = jnp.bfloat16

    # ---- vision path: TODO(synk) CLIPVisionModel ViT backbone stand-in
    #      (flatten + tanh pooled projection), then visual_projection (no bias).
    pooled = jnp.tanh(jnp.dot(pix_ref[...].astype(bf16), wpool_ref[...],
                              preferred_element_type=f32))                       # (Bi,128) f32
    image_features = jnp.dot(pooled.astype(bf16), wvis_ref[...],
                             preferred_element_type=f32)                          # (Bi,PROJ) f32

    # ---- text path: TODO(synk) HF AutoModel text transformer replaced by a deterministic
    #      embedding + 6 elementwise tanh-affine layer stand-in, fully in-kernel.
    ids = tok_ref[:, 0:1]                                                         # (TOKENS,1) i32
    tt = tok_ref[:, 1:2]                                                          # (TOKENS,1) i32
    mask = tok_ref[:, 2:3].astype(f32)                                            # (TOKENS,1) f32
    col = lax.broadcasted_iota(jnp.int32, (TOKENS, EMB_ROWS), 1)
    # Two-hot lookup: selects token-embedding row AND type-embedding row in one matmul.
    two_hot = jnp.where(jnp.logical_or(col == ids, col == tt + VOCAB), f32(1), f32(0))
    h0 = jnp.dot(two_hot.astype(bf16), emb_ref[...], preferred_element_type=f32)  # (TOKENS,H)
    h0 = h0 * mask                                                                 # mask gating

    # Extract the 8 CLS rows ONCE (token 0 of each sequence in the flat layout);
    # the layer stand-in is elementwise so only these rows ever reach the output.
    srow = lax.broadcasted_iota(jnp.int32, (BATCH_TXT, TOKENS), 0)
    scol = lax.broadcasted_iota(jnp.int32, (BATCH_TXT, TOKENS), 1)
    sel = jnp.where(scol == srow * SEQ_LEN, f32(1), f32(0))                        # (Bt,TOKENS)
    x = jnp.dot(sel, h0, preferred_element_type=f32)                               # (Bt,H) f32

    cls_by_layer = []
    for l in range(NUM_TEXT_LAYERS):
        sc = misc_ref[l:l + 1, 0:TEXT_HIDDEN]                                      # (1,H)
        sh = misc_ref[l:l + 1, TEXT_HIDDEN:2 * TEXT_HIDDEN]                         # (1,H)
        x = jnp.tanh(x * sc + sh)                                                  # f32 VPU/EUP
        cls_by_layer.append(x)

    # output_vector = concat(CLS of hidden_states[-1..-6]) -> one fused matmul with the
    # full (6H, PROJ) weight (depth order = last layer first), bias folded from misc row 6.
    concat = jnp.concatenate(cls_by_layer[::-1], axis=-1)                           # (Bt, 6H)
    bias = misc_ref[NUM_TEXT_LAYERS:NUM_TEXT_LAYERS + 1, :]                          # (1,PROJ)
    text_features = jnp.dot(concat.astype(bf16), wout_ref[...],
                            preferred_element_type=f32) + bias                       # (Bt,PROJ)

    # ---- ClipModel head: L2 normalise (f32 rsqrt on EUP, eps-guarded), fold exp(logit_scale)
    #      into the text features once, then both similarity matmuls (contract last dims).
    img_n = image_features * lax.rsqrt(
        jnp.sum(image_features * image_features, axis=-1, keepdims=True) + NORM_EPS)
    txt_n = text_features * lax.rsqrt(
        jnp.sum(text_features * text_features, axis=-1, keepdims=True) + NORM_EPS)
    log_scale = misc_ref[NUM_TEXT_LAYERS + 1:NUM_TEXT_LAYERS + 2, 0:1]               # (1,1)
    txt_s = txt_n * jnp.exp(log_scale)

    dn = (((1,), (1,)), ((), ()))   # contract last dims; no operand transposes materialise
    li = lax.dot_general(img_n, txt_s, dn, preferred_element_type=f32)              # (Bi,Bt)
    lt = lax.dot_general(txt_s, img_n, dn, preferred_element_type=f32)              # (Bt,Bi) == li.T

    # One shared placement matrix (BATCH_IMG == BATCH_TXT): puts the (8,8) logits into the
    # first 8 lanes of a (8,128) buffer so the final stores are full-lane (unmasked).
    r = lax.broadcasted_iota(jnp.int32, (BATCH_TXT, LOGITS_PAD), 0)
    c = lax.broadcasted_iota(jnp.int32, (BATCH_TXT, LOGITS_PAD), 1)
    place = jnp.where(c == r, f32(1), f32(0))                                        # (8,128)
    li_ref[...] = jnp.dot(li, place, preferred_element_type=f32)
    lt_ref[...] = jnp.dot(lt, place, preferred_element_type=f32)


# ------------------------------ ClipModel.forward ----------------------------
@jax.jit
def clip_model_forward(params, pixel_values, input_ids, attention_mask, token_type_ids):
    # Layout plumbing only (tiny, fused by XLA): flatten NCHW pixels, pack token tensors.
    pix_flat = pixel_values.reshape(BATCH_IMG, PIX_FLAT).astype(jnp.float32)
    tok_packed = jnp.stack(
        [input_ids.reshape(TOKENS).astype(jnp.int32),
         token_type_ids.reshape(TOKENS).astype(jnp.int32),
         attention_mask.reshape(TOKENS).astype(jnp.int32)], axis=1)                 # (TOKENS, 3)

    def full(shape):
        return pl.BlockSpec(shape, lambda i, _s=shape: (0,) * len(_s))

    li_pad, lt_pad = pl.pallas_call(
        _clip_fused_kernel,
        out_shape=(
            jax.ShapeDtypeStruct((BATCH_IMG, LOGITS_PAD), jnp.float32),
            jax.ShapeDtypeStruct((BATCH_TXT, LOGITS_PAD), jnp.float32),
        ),
        grid=(1,),   # single step on purpose: latency-bound, <0.5 MiB live data in VMEM
        in_specs=[
            full((BATCH_IMG, PIX_FLAT)),
            full((TOKENS, 3)),
            full((EMB_ROWS, TEXT_HIDDEN)),
            full((MISC_ROWS, LOGITS_PAD)),
            full((PIX_FLAT, VISION_HIDDEN)),
            full((VISION_HIDDEN, PROJ_DIM)),
            full((NUM_TEXT_LAYERS * TEXT_HIDDEN, PROJ_DIM)),
        ],
        out_specs=(
            full((BATCH_IMG, LOGITS_PAD)),
            full((BATCH_TXT, LOGITS_PAD)),
        ),
        compiler_params=pltpu.CompilerParams(dimension_semantics=("arbitrary",)),
    )(pix_flat, tok_packed, params["emb"], params["misc"],
      params["vis_pool_w"], params["visual_projection_w"], params["output_linear_w"])

    logits_per_image = li_pad[:, :BATCH_TXT]
    logits_per_text = lt_pad[:, :BATCH_IMG]
    return logits_per_image, logits_per_text


# --------------------------------- params ------------------------------------
def init_params(key):
    ks = jax.random.split(key, 8)

    # TODO(synk): stand-in backbone parameters (pretrained HF backbones replaced).
    tok_emb = 0.1 * jax.random.normal(ks[0], (VOCAB, TEXT_HIDDEN), jnp.float32)
    type_emb = 0.1 * jax.random.normal(ks[1], (2, TEXT_HIDDEN), jnp.float32)
    layer_scale = 1.0 + 0.05 * jax.random.normal(ks[2], (NUM_TEXT_LAYERS, TEXT_HIDDEN), jnp.float32)
    layer_shift = 0.05 * jax.random.normal(ks[3], (NUM_TEXT_LAYERS, TEXT_HIDDEN), jnp.float32)
    out_bias = 0.01 * jax.random.normal(ks[4], (PROJ_DIM,), jnp.float32)
    logit_scale = jnp.float32(2.6592)

    # Lane-dense packed misc buffer: rows 0..5 = [layer_scale | layer_shift] (64+64 lanes),
    # row 6 = output_linear bias, row 7 lane 0 = logit_scale.  Single DMA, full (8,128) tile.
    misc = jnp.zeros((MISC_ROWS, LOGITS_PAD), jnp.float32)
    misc = misc.at[:NUM_TEXT_LAYERS, :TEXT_HIDDEN].set(layer_scale)
    misc = misc.at[:NUM_TEXT_LAYERS, TEXT_HIDDEN:2 * TEXT_HIDDEN].set(layer_shift)
    misc = misc.at[NUM_TEXT_LAYERS, :].set(out_bias)
    misc = misc.at[NUM_TEXT_LAYERS + 1, 0].set(logit_scale)

    # Combined embedding table (token rows + 2 token-type rows), bf16 storage.
    emb = jnp.concatenate([tok_emb, type_emb], axis=0).astype(jnp.bfloat16)

    # Module-owned matmul weights, stored ONCE in bf16 (K,N)/chunked kernel layout
    # (no per-forward transposes):
    #   visual_projection_w  == torch visual_projection.weight.T            (K,N)
    #   output_linear_w      == torch output_linear.weight.T, rows ordered by CLS depth
    #                           (chunk 0 == hidden_states[-1], ..., chunk 5 == hidden_states[-6])
    return {
        "emb": emb,
        "misc": misc,
        "vis_pool_w": (0.02 * jax.random.normal(
            ks[5], (PIX_FLAT, VISION_HIDDEN), jnp.float32)).astype(jnp.bfloat16),
        "visual_projection_w": (0.02 * jax.random.normal(
            ks[6], (VISION_HIDDEN, PROJ_DIM), jnp.float32)).astype(jnp.bfloat16),
        "output_linear_w": (0.02 * jax.random.normal(
            ks[7], (NUM_TEXT_LAYERS * TEXT_HIDDEN, PROJ_DIM), jnp.float32)).astype(jnp.bfloat16),
    }


if __name__ == "__main__":
    key = jax.random.PRNGKey(0)
    kp, k1, k2 = jax.random.split(key, 3)
    params = init_params(kp)

    pixel_values = jax.random.normal(k1, (BATCH_IMG, IMG_C, IMG_H, IMG_W), jnp.float32)  # NCHW
    input_ids = jax.random.randint(k2, (BATCH_TXT, SEQ_LEN), 0, VOCAB)
    attention_mask = jnp.ones((BATCH_TXT, SEQ_LEN), jnp.int32)
    token_type_ids = jnp.zeros((BATCH_TXT, SEQ_LEN), jnp.int32)

    logits_per_image, logits_per_text = clip_model_forward(
        params, pixel_values, input_ids, attention_mask, token_type_ids)
    jax.block_until_ready((logits_per_image, logits_per_text))

    assert logits_per_image.shape == (BATCH_IMG, BATCH_TXT)
    assert logits_per_text.shape == (BATCH_TXT, BATCH_IMG)
    assert bool(jnp.all(jnp.isfinite(logits_per_image)))
    # logits_per_text must equal logits_per_image.T (as in the torch module)
    assert bool(jnp.allclose(logits_per_text, logits_per_image.T, atol=1e-4))
    print("KERNEL_OK")
</pallas_src>

<mosaic_0001>
module attributes {stable_mosaic.version = 11 : i64} {
  func.func @_clip_fused_kernel(%arg0: i32, %arg1: memref<8x768xf32, #tpu.memory_space<vmem>>, %arg2: memref<64x3xi32, #tpu.memory_space<vmem>>, %arg3: memref<34x64xbf16, #tpu.memory_space<vmem>>, %arg4: memref<8x128xf32, #tpu.memory_space<vmem>>, %arg5: memref<768x128xbf16, #tpu.memory_space<vmem>>, %arg6: memref<128x128xbf16, #tpu.memory_space<vmem>>, %arg7: memref<384x128xbf16, #tpu.memory_space<vmem>>, %arg8: memref<8x128xf32, #tpu.memory_space<vmem>>, %arg9: memref<8x128xf32, #tpu.memory_space<vmem>>) attributes {dimension_semantics = [#tpu.dimension_semantics<arbitrary>], iteration_bounds = array<i64: 1>, scalar_prefetch = 0 : i64, scratch_operands = 0 : i64, tpu.core_type = #tpu.core_type<tc>, window_params = [{pipeline_mode = #tpu.pipeline_mode<synchronous>, transform_indices = @transform_0, window_bounds = array<i64: 8, 768>}, {pipeline_mode = #tpu.pipeline_mode<synchronous>, transform_indices = @transform_1, window_bounds = array<i64: 64, 3>}, {pipeline_mode = #tpu.pipeline_mode<synchronous>, transform_indices = @transform_2, window_bounds = array<i64: 34, 64>}, {pipeline_mode = #tpu.pipeline_mode<synchronous>, transform_indices = @transform_3, window_bounds = array<i64: 8, 128>}, {pipeline_mode = #tpu.pipeline_mode<synchronous>, transform_indices = @transform_4, window_bounds = array<i64: 768, 128>}, {pipeline_mode = #tpu.pipeline_mode<synchronous>, transform_indices = @transform_5, window_bounds = array<i64: 128, 128>}, {pipeline_mode = #tpu.pipeline_mode<synchronous>, transform_indices = @transform_6, window_bounds = array<i64: 384, 128>}, {pipeline_mode = #tpu.pipeline_mode<synchronous>, transform_indices = @transform_7, window_bounds = array<i64: 8, 128>}, {pipeline_mode = #tpu.pipeline_mode<synchronous>, transform_indices = @transform_8, window_bounds = array<i64: 8, 128>}]} {
    %c0 = arith.constant 0 : index
    %c0_0 = arith.constant 0 : index
    %0 = vector.load %arg1[%c0, %c0_0] : memref<8x768xf32, #tpu.memory_space<vmem>>, vector<8x768xf32>
    %1 = arith.truncf %0 : vector<8x768xf32> to vector<8x768xbf16>
    %c0_1 = arith.constant 0 : index
    %c0_2 = arith.constant 0 : index
    %2 = vector.load %arg5[%c0_1, %c0_2] : memref<768x128xbf16, #tpu.memory_space<vmem>>, vector<768x128xbf16>
    %cst = arith.constant dense<0.000000e+00> : vector<8x128xf32>
    %3 = tpu.matmul %1, %2, %cst {dimension_numbers = #tpu.dot_dimension_numbers<[1], [0], [0], [1], [0, 0, 1, 1], [], []>} : vector<8x768xbf16>, vector<768x128xbf16>, vector<8x128xf32> -> vector<8x128xf32>
    %4 = math.tanh %3 : vector<8x128xf32>
    %5 = arith.truncf %4 : vector<8x128xf32> to vector<8x128xbf16>
    %c0_3 = arith.constant 0 : index
    %c0_4 = arith.constant 0 : index
    %6 = vector.load %arg6[%c0_3, %c0_4] : memref<128x128xbf16, #tpu.memory_space<vmem>>, vector<128x128xbf16>
    %cst_5 = arith.constant dense<0.000000e+00> : vector<8x128xf32>
    %7 = tpu.matmul %5, %6, %cst_5 {dimension_numbers = #tpu.dot_dimension_numbers<[1], [0], [0], [1], [0, 0, 1, 1], [], []>} : vector<8x128xbf16>, vector<128x128xbf16>, vector<8x128xf32> -> vector<8x128xf32>
    %c0_6 = arith.constant 0 : index
    %c0_7 = arith.constant 0 : index
    %8 = vector.load %arg2[%c0_6, %c0_7] : memref<64x3xi32, #tpu.memory_space<vmem>>, vector<64x1xi32>
    %c0_8 = arith.constant 0 : index
    %c1 = arith.constant 1 : index
    %9 = vector.load %arg2[%c0_8, %c1] : memref<64x3xi32, #tpu.memory_space<vmem>>, vector<64x1xi32>
    %c0_9 = arith.constant 0 : index
    %c2 = arith.constant 2 : index
    %10 = vector.load %arg2[%c0_9, %c2] : memref<64x3xi32, #tpu.memory_space<vmem>>, vector<64x1xi32>
    %11 = arith.sitofp %10 : vector<64x1xi32> to vector<64x1xf32>
    %12 = tpu.iota {dimensions = array<i32: 1>} : vector<64x34xi32>
    %13 = vector.broadcast %8 : vector<64x1xi32> to vector<64x34xi32>
    %14 = arith.cmpi eq, %12, %13 : vector<64x34xi32>
    %c32_i32 = arith.constant 32 : i32
    %15 = vector.broadcast %c32_i32 : i32 to vector<64x1xi32>
    %16 = arith.addi %9, %15 : vector<64x1xi32>
    %17 = vector.broadcast %16 : vector<64x1xi32> to vector<64x34xi32>
    %18 = arith.cmpi eq, %12, %17 : vector<64x34xi32>
    %19 = arith.ori %14, %18 : vector<64x34xi1>
    %cst_10 = arith.constant 1.000000e+00 : f32
    %cst_11 = arith.constant 0.000000e+00 : f32
    %20 = vector.broadcast %cst_10 : f32 to vector<64x34xf32>
    %21 = vector.broadcast %cst_11 : f32 to vector<64x34xf32>
    %22 = arith.select %19, %20, %21 : vector<64x34xi1>, vector<64x34xf32>
    %23 = arith.truncf %22 : vector<64x34xf32> to vector<64x34xbf16>
    %c0_12 = arith.constant 0 : index
    %c0_13 = arith.constant 0 : index
    %24 = vector.load %arg3[%c0_12, %c0_13] : memref<34x64xbf16, #tpu.memory_space<vmem>>, vector<34x64xbf16>
    %cst_14 = arith.constant dense<0.000000e+00> : vector<64x64xf32>
    %25 = tpu.matmul %23, %24, %cst_14 {dimension_numbers = #tpu.dot_dimension_numbers<[1], [0], [0], [1], [0, 0, 1, 1], [], []>} : vector<64x34xbf16>, vector<34x64xbf16>, vector<64x64xf32> -> vector<64x64xf32>
    %26 = vector.broadcast %11 : vector<64x1xf32> to vector<64x64xf32>
    %27 = arith.mulf %25, %26 : vector<64x64xf32>
    %28 = tpu.iota {dimensions = array<i32: 0>} : vector<8x64xi32>
    %29 = tpu.iota {dimensions = array<i32: 1>} : vector<8x64xi32>
    %c8_i32 = arith.constant 8 : i32
    %30 = vector.broadcast %c8_i32 : i32 to vector<8x64xi32>
    %31 = arith.muli %28, %30 : vector<8x64xi32>
    %32 = arith.cmpi eq, %29, %31 : vector<8x64xi32>
    %cst_15 = arith.constant 1.000000e+00 : f32
    %cst_16 = arith.constant 0.000000e+00 : f32
    %33 = vector.broadcast %cst_15 : f32 to vector<8x64xf32>
    %34 = vector.broadcast %cst_16 : f32 to vector<8x64xf32>
    %35 = arith.select %32, %33, %34 : vector<8x64xi1>, vector<8x64xf32>
    %cst_17 = arith.constant dense<0.000000e+00> : vector<8x64xf32>
    %36 = tpu.matmul %35, %27, %cst_17 {dimension_numbers = #tpu.dot_dimension_numbers<[1], [0], [0], [1], [0, 0, 1, 1], [], []>} : vector<8x64xf32>, vector<64x64xf32>, vector<8x64xf32> -> vector<8x64xf32>
    %c0_18 = arith.constant 0 : index
    %c0_19 = arith.constant 0 : index
    %37 = vector.load %arg4[%c0_18, %c0_19] : memref<8x128xf32, #tpu.memory_space<vmem>>, vector<1x64xf32>
    %c0_20 = arith.constant 0 : index
    %c64 = arith.constant 64 : index
    %38 = vector.load %arg4[%c0_20, %c64] : memref<8x128xf32, #tpu.memory_space<vmem>>, vector<1x64xf32>
    %39 = vector.broadcast %37 : vector<1x64xf32> to vector<8x64xf32>
    %40 = arith.mulf %36, %39 : vector<8x64xf32>
    %41 = vector.broadcast %38 : vector<1x64xf32> to vector<8x64xf32>
    %42 = arith.addf %40, %41 : vector<8x64xf32>
    %43 = math.tanh %42 : vector<8x64xf32>
    %c1_21 = arith.constant 1 : index
    %c0_22 = arith.constant 0 : index
    %44 = vector.load %arg4[%c1_21, %c0_22] : memref<8x128xf32, #tpu.memory_space<vmem>>, vector<1x64xf32>
    %c1_23 = arith.constant 1 : index
    %c64_24 = arith.constant 64 : index
    %45 = vector.load %arg4[%c1_23, %c64_24] : memref<8x128xf32, #tpu.memory_space<vmem>>, vector<1x64xf32>
    %46 = vector.broadcast %44 : vector<1x64xf32> to vector<8x64xf32>
    %47 = arith.mulf %43, %46 : vector<8x64xf32>
    %48 = vector.broadcast %45 : vector<1x64xf32> to vector<8x64xf32>
    %49 = arith.addf %47, %48 : vector<8x64xf32>
    %50 = math.tanh %49 : vector<8x64xf32>
    %c2_25 = arith.constant 2 : index
    %c0_26 = arith.constant 0 : index
    %51 = vector.load %arg4[%c2_25, %c0_26] : memref<8x128xf32, #tpu.memory_space<vmem>>, vector<1x64xf32>
    %c2_27 = arith.constant 2 : index
    %c64_28 = arith.constant 64 : index
    %52 = vector.load %arg4[%c2_27, %c64_28] : memref<8x128xf32, #tpu.memory_space<vmem>>, vector<1x64xf32>
    %53 = vector.broadcast %51 : vector<1x64xf32> to vector<8x64xf32>
    %54 = arith.mulf %50, %53 : vector<8x64xf32>
    %55 = vector.broadcast %52 : vector<1x64xf32> to vector<8x64xf32>
    %56 = arith.addf %54, %55 : vector<8x64xf32>
    %57 = math.tanh %56 : vector<8x64xf32>
    %c3 = arith.constant 3 : index
    %c0_29 = arith.constant 0 : index
    %58 = vector.load %arg4[%c3, %c0_29] : memref<8x128xf32, #tpu.memory_space<vmem>>, vector<1x64xf32>
    %c3_30 = arith.constant 3 : index
    %c64_31 = arith.constant 64 : index
    %59 = vector.load %arg4[%c3_30, %c64_31] : memref<8x128xf32, #tpu.memory_space<vmem>>, vector<1x64xf32>
    %60 = vector.broadcast %58 : vector<1x64xf32> to vector<8x64xf32>
    %61 = arith.mulf %57, %60 : vector<8x64xf32>
    %62 = vector.broadcast %59 : vector<1x64xf32> to vector<8x64xf32>
    %63 = arith.addf %61, %62 : vector<8x64xf32>
    %64 = math.tanh %63 : vector<8x64xf32>
    %c4 = arith.constant 4 : index
    %c0_32 = arith.constant 0 : index
    %65 = vector.load %arg4[%c4, %c0_32] : memref<8x128xf32, #tpu.memory_space<vmem>>, vector<1x64xf32>
    %c4_33 = arith.constant 4 : index
    %c64_34 = arith.constant 64 : index
    %66 = vector.load %arg4[%c4_33, %c64_34] : memref<8x128xf32, #tpu.memory_space<vmem>>, vector<1x64xf32>
    %67 = vector.broadcast %65 : vector<1x64xf32> to vector<8x64xf32>
    %68 = arith.mulf %64, %67 : vector<8x64xf32>
    %69 = vector.broadcast %66 : vector<1x64xf32> to vector<8x64xf32>
    %70 = arith.addf %68, %69 : vector<8x64xf32>
    %71 = math.tanh %70 : vector<8x64xf32>
    %c5 = arith.constant 5 : index
    %c0_35 = arith.constant 0 : index
    %72 = vector.load %arg4[%c5, %c0_35] : memref<8x128xf32, #tpu.memory_space<vmem>>, vector<1x64xf32>
    %c5_36 = arith.constant 5 : index
    %c64_37 = arith.constant 64 : index
    %73 = vector.load %arg4[%c5_36, %c64_37] : memref<8x128xf32, #tpu.memory_space<vmem>>, vector<1x64xf32>
    %74 = vector.broadcast %72 : vector<1x64xf32> to vector<8x64xf32>
    %75 = arith.mulf %71, %74 : vector<8x64xf32>
    %76 = vector.broadcast %73 : vector<1x64xf32> to vector<8x64xf32>
    %77 = arith.addf %75, %76 : vector<8x64xf32>
    %78 = math.tanh %77 : vector<8x64xf32>
    %79 = tpu.concatenate %78, %71, %64, %57, %50, %43 in 1 : vector<8x64xf32>, vector<8x64xf32>, vector<8x64xf32>, vector<8x64xf32>, vector<8x64xf32>, vector<8x64xf32> -> vector<8x384xf32>
    %c6 = arith.constant 6 : index
    %c0_38 = arith.constant 0 : index
    %80 = vector.load %arg4[%c6, %c0_38] : memref<8x128xf32, #tpu.memory_space<vmem>>, vector<1x128xf32>
    %81 = arith.truncf %79 : vector<8x384xf32> to vector<8x384xbf16>
    %c0_39 = arith.constant 0 : index
    %c0_40 = arith.constant 0 : index
    %82 = vector.load %arg7[%c0_39, %c0_40] : memref<384x128xbf16, #tpu.memory_space<vmem>>, vector<384x128xbf16>
    %cst_41 = arith.constant dense<0.000000e+00> : vector<8x128xf32>
    %83 = tpu.matmul %81, %82, %cst_41 {dimension_numbers = #tpu.dot_dimension_numbers<[1], [0], [0], [1], [0, 0, 1, 1], [], []>} : vector<8x384xbf16>, vector<384x128xbf16>, vector<8x128xf32> -> vector<8x128xf32>
    %84 = vector.broadcast %80 : vector<1x128xf32> to vector<8x128xf32>
    %85 = arith.addf %83, %84 : vector<8x128xf32>
    %86 = arith.mulf %7, %7 : vector<8x128xf32>
    %cst_42 = arith.constant dense<0.000000e+00> : vector<8xf32>
    %87 = vector.multi_reduction <add>, %86, %cst_42 [1] : vector<8x128xf32> to vector<8xf32>
    %88 = vector.shape_cast %87 : vector<8xf32> to vector<8x1xf32>
    %cst_43 = arith.constant 9.99999996E-13 : f32
    %89 = vector.broadcast %cst_43 : f32 to vector<8x1xf32>
    %90 = arith.addf %88, %89 : vector<8x1xf32>
    %91 = math.rsqrt %90 : vector<8x1xf32>
    %92 = vector.broadcast %91 : vector<8x1xf32> to vector<8x128xf32>
    %93 = arith.mulf %7, %92 : vector<8x128xf32>
    %94 = arith.mulf %85, %85 : vector<8x128xf32>
    %cst_44 = arith.constant dense<0.000000e+00> : vector<8xf32>
    %95 = vector.multi_reduction <add>, %94, %cst_44 [1] : vector<8x128xf32> to vector<8xf32>
    %96 = vector.shape_cast %95 : vector<8xf32> to vector<8x1xf32>
    %cst_45 = arith.constant 9.99999996E-13 : f32
    %97 = vector.broadcast %cst_45 : f32 to vector<8x1xf32>
    %98 = arith.addf %96, %97 : vector<8x1xf32>
    %99 = math.rsqrt %98 : vector<8x1xf32>
    %100 = vector.broadcast %99 : vector<8x1xf32> to vector<8x128xf32>
    %101 = arith.mulf %85, %100 : vector<8x128xf32>
    %c7 = arith.constant 7 : index
    %c0_46 = arith.constant 0 : index
    %102 = vector.load %arg4[%c7, %c0_46] : memref<8x128xf32, #tpu.memory_space<vmem>>, vector<1x1xf32>
    %103 = math.exp %102 : vector<1x1xf32>
    %104 = vector.broadcast %103 : vector<1x1xf32> to vector<8x128xf32>
    %105 = arith.mulf %101, %104 : vector<8x128xf32>
    %cst_47 = arith.constant dense<0.000000e+00> : vector<8x8xf32>
    %106 = tpu.matmul %93, %105, %cst_47 {dimension_numbers = #tpu.dot_dimension_numbers<[1], [1], [0], [0], [0, 0, 1, 0], [], []>} : vector<8x128xf32>, vector<8x128xf32>, vector<8x8xf32> -> vector<8x8xf32>
    %cst_48 = arith.constant dense<0.000000e+00> : vector<8x8xf32>
    %107 = tpu.matmul %105, %93, %cst_48 {dimension_numbers = #tpu.dot_dimension_numbers<[1], [1], [0], [0], [0, 0, 1, 0], [], []>} : vector<8x128xf32>, vector<8x128xf32>, vector<8x8xf32> -> vector<8x8xf32>
    %108 = tpu.iota {dimensions = array<i32: 0>} : vector<8x128xi32>
    %109 = tpu.iota {dimensions = array<i32: 1>} : vector<8x128xi32>
    %110 = arith.cmpi eq, %109, %108 : vector<8x128xi32>
    %cst_49 = arith.constant 1.000000e+00 : f32
    %cst_50 = arith.constant 0.000000e+00 : f32
    %111 = vector.broadcast %cst_49 : f32 to vector<8x128xf32>
    %112 = vector.broadcast %cst_50 : f32 to vector<8x128xf32>
    %113 = arith.select %110, %111, %112 : vector<8x128xi1>, vector<8x128xf32>
    %cst_51 = arith.constant dense<0.000000e+00> : vector<8x128xf32>
    %114 = tpu.matmul %106, %113, %cst_51 {dimension_numbers = #tpu.dot_dimension_numbers<[1], [0], [0], [1], [0, 0, 1, 1], [], []>} : vector<8x8xf32>, vector<8x128xf32>, vector<8x128xf32> -> vector<8x128xf32>
    %c0_52 = arith.constant 0 : index
    %c0_53 = arith.constant 0 : index
    %115 = vector.load %arg8[%c0_52, %c0_53] : memref<8x128xf32, #tpu.memory_space<vmem>>, vector<8x128xf32>
    tpu.vector_store %arg8[%c0_52, %c0_53], %114 {strides = array<i32>} : memref<8x128xf32, #tpu.memory_space<vmem>>, vector<8x128xf32>,
    %cst_54 = arith.constant dense<0.000000e+00> : vector<8x128xf32>
    %116 = tpu.matmul %107, %113, %cst_54 {dimension_numbers = #tpu.dot_dimension_numbers<[1], [0], [0], [1], [0, 0, 1, 1], [], []>} : vector<8x8xf32>, vector<8x128xf32>, vector<8x128xf32> -> vector<8x128xf32>
    %c0_55 = arith.constant 0 : index
    %c0_56 = arith.constant 0 : index
    %117 = vector.load %arg9[%c0_55, %c0_56] : memref<8x128xf32, #tpu.memory_space<vmem>>, vector<8x128xf32>
    tpu.vector_store %arg9[%c0_55, %c0_56], %116 {strides = array<i32>} : memref<8x128xf32, #tpu.memory_space<vmem>>, vector<8x128xf32>,
    return
  }
  func.func @transform_0(%arg0: i32) -> (i32, i32) {
    %c0_i32 = arith.constant 0 : i32
    %c0_i32_0 = arith.constant 0 : i32
    %c0_i32_1 = arith.constant 0 : i32
    return %c0_i32, %c0_i32_0 : i32, i32
  }
  func.func @transform_1(%arg0: i32) -> (i32, i32) {
    %c0_i32 = arith.constant 0 : i32
    %c0_i32_0 = arith.constant 0 : i32
    %c0_i32_1 = arith.constant 0 : i32
    return %c0_i32, %c0_i32_0 : i32, i32
  }
  func.func @transform_2(%arg0: i32) -> (i32, i32) {
    %c0_i32 = arith.constant 0 : i32
    %c0_i32_0 = arith.constant 0 : i32
    %c0_i32_1 = arith.constant 0 : i32
    return %c0_i32, %c0_i32_0 : i32, i32
  }
  func.func @transform_3(%arg0: i32) -> (i32, i32) {
    %c0_i32 = arith.constant 0 : i32
    %c0_i32_0 = arith.constant 0 : i32
    %c0_i32_1 = arith.constant 0 : i32
    return %c0_i32, %c0_i32_0 : i32, i32
  }
  func.func @transform_4(%arg0: i32) -> (i32, i32) {
    %c0_i32 = arith.constant 0 : i32
    %c0_i32_0 = arith.constant 0 : i32
    %c0_i32_1 = arith.constant 0 : i32
    return %c0_i32, %c0_i32_0 : i32, i32
  }
  func.func @transform_5(%arg0: i32) -> (i32, i32) {
    %c0_i32 = arith.constant 0 : i32
    %c0_i32_0 = arith.constant 0 : i32
    %c0_i32_1 = arith.constant 0 : i32
    return %c0_i32, %c0_i32_0 : i32, i32
  }
  func.func @transform_6(%arg0: i32) -> (i32, i32) {
    %c0_i32 = arith.constant 0 : i32
    %c0_i32_0 = arith.constant 0 : i32
    %c0_i32_1 = arith.constant 0 : i32
    return %c0_i32, %c0_i32_0 : i32, i32
  }
  func.func @transform_7(%arg0: i32) -> (i32, i32) {
    %c0_i32 = arith.constant 0 : i32
    %c0_i32_0 = arith.constant 0 : i32
    %c0_i32_1 = arith.constant 0 : i32
    return %c0_i32, %c0_i32_0 : i32, i32
  }
  func.func @transform_8(%arg0: i32) -> (i32, i32) {
    %c0_i32 = arith.constant 0 : i32
    %c0_i32_0 = arith.constant 0 : i32
    %c0_i32_1 = arith.constant 0 : i32
    return %c0_i32, %c0_i32_0 : i32, i32
  }
}

</mosaic_0001>

<bundles_post_ra>
// kernel: clip_model_forward.1
= control target key start
LH: loop header
LB: loop body
LE: loop exit
PB: predicated region body
PF: predicated region fallthrough
CT: control target
= control target key end

     0   :  { %14 = vsyncpa [#allocation3], 0  ;;  %s2760_s0 = inlined_call_operand.vmem [shape: f32[8,768], index: 0, kind: input, shape index: {}]   ;;  %s2761_s1 = inlined_call_operand.vmem [shape: s32[64,3], index: 1, kind: input, shape index: {}]   ;;  %s2762_s2 = inlined_call_operand.vmem [shape: bf16[34,64], index: 2, kind: input, shape index: {}]   ;;  %s2763_s3 = inlined_call_operand.vmem [shape: f32[8,128], index: 3, kind: input, shape index: {}]   ;;  %s2764_s4 = inlined_call_operand.vmem [shape: bf16[768,128], index: 4, kind: input, shape index: {}]   ;;  %s2765_s5 = inlined_call_operand.vmem [shape: bf16[128,128], index: 5, kind: input, shape index: {}]   ;;  %s2766_s6 = inlined_call_operand.hbm [shape: bf16[384,128], index: 6, kind: input, shape index: {}]   ;;  %s2767_s7 = inlined_call_operand.hbm [shape: f32[8,128], index: 7, kind: output, shape index: {0}]   ;;  %s2768_s8 = inlined_call_operand.hbm [shape: f32[8,128], index: 8, kind: output, shape index: {1}]  }
   0x1   :  { %15 = vsyncpa [#allocation4], 0 }
   0x2   :  { %16 = vsyncpa [#allocation7], 0  ;;  %s2254_s27 = smov [#allocation2]   ;;  %s2182_s9 = scalar_lea.hbm %s2766_s6, 3072 }
   0x3   :  { %s34_s28 = sshll.u32 %s2254_s27, 4  ;;  %p2183_p0 = scmp.ne.s32.totalorder %s2766_s6, %s2182_s9  ;;  %s35_s28 = int_to_ptr.vmem [resolvable:$true] %s34_s28 }
   0x4   :  { %p2186_p1 = scmp.lt.u32.totalorder %s2182_s9, %s2766_s6 }
   0x6   :  { %p2188_p2 = pnand %p2186_p1, %p2183_p0 }
   0x8   :  { %2191 = shalt.err (!%p2188_p2)
}
   0x9   :  { %s2192_s14 = scalar_lea.vmem %s35_s28, 3072  ;;  %p2197_p4 = scmp.lt.s32.totalorder %s35_s28, %s35_s28 }
   0xa   :  { %p2193_p3 = scmp.ne.s32.totalorder %s35_s28, %s2192_s14  ;;  %p2198_p5 = scmp.lt.s32.totalorder %s2192_s14, %s2192_s14 }
   0xc   :  { %p2199_p6 = por %p2198_p5, %p2197_p4 }
   0xe   :  { %p2200_p7 = pnand %p2199_p6, %p2193_p3 }
  0x10   :  { %2203 = shalt.err (!%p2200_p7)
}
  0x11   :  { %s2255_s15 = smov 64   ;;  %s2256_s16 = smov 4  }
  0x12   :  { %40 = dma.hbm_to_vmem [thread:$0]  %s2766_s6, 3072, %s35_s28, [#allocation3], %s2255_s15, %s2255_s15, %s2256_s16  }
  0x13   :  { %2248 = dma.done.wait [#allocation3], 3072  }
  0x14   :  { %2249 = vsyncadd [#allocation3], 4294964224  ;;  %v2257_v0 = vmov 0   ;;  %v2330_v1 = vld [vmem:[%s2761_s1 + $0x18] sm:$0xff]  ;;  %v2335_v2 = vld [vmem:[%s2761_s1] sm:$0xff]  ;;  %v2258_v9 = vmov 1  }
  0x15   :  { %2063 = vset.pattern.permute.xlu1 %v2257_v0  ;;  %2062 = vset.pattern.permute.xlu0 %v2257_v0  ;;  %v2340_v3 = vld [vmem:[%s2761_s1 + $0x10] sm:$0xff]  ;;  %v717_v5 = vadd.s32 32, %v2335_v2  ;;  %v2079_v6 = vld [vmem:[%s2764_s4 + $0x40] sm:$0xff]   ;;  %v2352_v7 = vld [vmem:[%s2761_s1 + $0x8] sm:$0xff]  ;;  %v720_v14 = vadd.s32 32, %v2330_v1  ;;  %v675_v56 = vcvt.s32.f32 %v2335_v2  ;;  %v2259_v58 = vmov 2  }
  0x16   :  { %695 = vperm.xlu1 %2063, %v2330_v1   ;;  %686 = vperm.xlu0 %2062, %v2335_v2   ;;  %v719_v4 = vadd.s32 32, %v2340_v3  ;;  %v2080_v8 = vld [vmem:[%s2764_s4] sm:$0xff]   ;;  %v2081_v10 = vld [vmem:[%s2764_s4 + $0x48] sm:$0xff]   ;;  %v718_v11 = vadd.s32 32, %v2352_v7  ;;  %v2083_v13 = vld [vmem:[%s2764_s4 + $0x50] sm:$0xff]   ;;  %v676_v59 = vcvt.s32.f32 %v2352_v7  ;;  %v677_v61 = vcvt.s32.f32 %v2340_v3 }
  0x17   :  { %1812 = vmatprep.subr.bf16.mxu0 %v2079_v6  ;;  %v2082_v12 = vld [vmem:[%s2764_s4 + $0x8] sm:$0xff]   ;;  %v2084_v15 = vld [vmem:[%s2764_s4 + $0x10] sm:$0xff]   ;;  %v2085_v16 = vld [vmem:[%s2764_s4 + $0x58] sm:$0xff]   ;;  %v678_v6 = vcvt.s32.f32 %v2330_v1  ;;  %vm810_vm0 = vcmask 1040384   ;;  %vm797_vm8 = vcmask 277504  }
  0x18   :  { %1813 = vmatpush3.bf16.msra.mxu0 %v2080_v8  ;;  %v2381_v17 = vld [vmem:[%s2761_s1 + $0x28] sm:$0xff]  ;;  %v2387_v18 = vld [vmem:[%s2761_s1 + $0x20] sm:$0xff]  ;;  %v2086_v19 = vld [vmem:[%s2764_s4 + $0x18] sm:$0xff]  }
  0x19   :  { %1814 = vmatprep.subr.bf16.mxu0 %v2081_v10  ;;  %v2087_v20 = vld [vmem:[%s2764_s4 + $0x60] sm:$0xff]   ;;  %v2399_v21 = vld [vmem:[%s2761_s1 + $0x30] sm:$0xff]  ;;  %v2089_v23 = vld [vmem:[%s2764_s4 + $0x68] sm:$0xff]   ;;  %v721_v25 = vadd.s32 32, %v2387_v18  ;;  %v722_v29 = vadd.s32 32, %v2381_v17  ;;  %v679_v2 = vcvt.s32.f32 %v2387_v18 }
  0x1a   :  { %2064 = vset.pattern.permute.xlu1 %v2258_v9  ;;  %2065 = vset.pattern.permute.xlu0 %v2258_v9  ;;  %v2088_v22 = vld [vmem:[%s2764_s4 + $0x20] sm:$0xff]   ;;  %v46_v27 = vld [vmem:[%s2760_s0 + $0x8] sm:$0xff]  ;;  %v723_v31 = vadd.s32 32, %v2399_v21  ;;  %v2091_v34 = vld [vmem:[%s2764_s4 + $0x70] sm:$0xff]   ;;  %v681_v10 = vcvt.s32.f32 %v2399_v21 }
  0x1b   :  { %732 = vperm.xlu0 %2065, %v719_v4   ;;  %726 = vperm.xlu1 %2064, %v717_v5   ;;  %v2095_v24 = vld [vmem:[%s2764_s4 + $0xc0] sm:$0xff]   ;;  %v52_v28 = vpack.c.bf16 %v46_v27, %v46_v27  ;;  %v2090_v30 = vld [vmem:[%s2764_s4 + $0x28] sm:$0xff]   ;;  %v2092_v35 = vld [vmem:[%s2764_s4 + $0x30] sm:$0xff]  }
  0x1c   :  { %1815 = vmatpush3.bf16.msra.mxu0 %v2082_v12  ;;  %v2096_v26 = vld [vmem:[%s2764_s4 + $0x80] sm:$0xff]   ;;  %1834 = vmatprep.subr.bf16.mxu1 %v2095_v24  ;;  %v2099_v32 = vld [vmem:[%s2764_s4 + $0xc8] sm:$0xff]   ;;  %v2442_v36 = vld [vmem:[%s2761_s1 + $0x38] sm:$0xff] }
  0x1d   :  { %1816 = vmatprep.subr.bf16.mxu0 %v2083_v13  ;;  %1835 = vmatpush3.bf16.msra.mxu1 %v2096_v26  ;;  %v2100_v33 = vld [vmem:[%s2764_s4 + $0x88] sm:$0xff]   ;;  %v2103_v37 = vld [vmem:[%s2764_s4 + $0xd0] sm:$0xff]   ;;  %v2093_v39 = vld [vmem:[%s2764_s4 + $0x78] sm:$0xff]   ;;  %v724_v44 = vadd.s32 32, %v2442_v36 }
  0x1e   :  { %473 = vmatprep.mubr.bf16.mxu0 %v52_v28  ;;  %1836 = vmatprep.subr.bf16.mxu1 %v2099_v32  ;;  %v2104_v38 = vld [vmem:[%s2764_s4 + $0x90] sm:$0xff]   ;;  %v2094_v40 = vld [vmem:[%s2764_s4 + $0x38] sm:$0xff]   ;;  %v45_v41 = vld [vmem:[%s2760_s0] sm:$0xff] }
  0x1f   :  { %2066 = vset.pattern.permute.xlu0 %v2257_v0  ;;  %729 = vperm.xlu1 %2064, %v718_v11   ;;  %v2107_v42 = vld [vmem:[%s2764_s4 + $0xd8] sm:$0xff]   ;;  %v2097_v45 = vld [vmem:[%s2764_s4 + $0x140] sm:$0xff]   ;;  %v51_v47 = vpack.c.bf16 %v45_v41, %v45_v41  ;;  %v2101_v50 = vld [vmem:[%s2764_s4 + $0x148] sm:$0xff]  }
  0x20   :  { %689 = vperm.xlu0 %2066, %v2352_v7   ;;  %1817 = vmatpush3.bf16.msra.mxu0 %v2084_v15  ;;  %v2108_v43 = vld [vmem:[%s2764_s4 + $0x98] sm:$0xff]   ;;  %v2098_v46 = vld [vmem:[%s2764_s4 + $0x100] sm:$0xff]   ;;  %v2102_v51 = vld [vmem:[%s2764_s4 + $0x108] sm:$0xff]  }
  0x21   :  { %1818 = vmatprep.subr.bf16.mxu0 %v2085_v16  ;;  %1837 = vmatpush3.bf16.msra.mxu1 %v2100_v33  ;;  %v2111_v48 = vld [vmem:[%s2764_s4 + $0xe0] sm:$0xff]   ;;  %v2115_v52 = vld [vmem:[%s2764_s4 + $0xe8] sm:$0xff]   ;;  %v2105_v54 = vld [vmem:[%s2764_s4 + $0x150] sm:$0xff]   ;;  %v683_v33 = vlaneseq }
  0x22   :  { %1838 = vmatprep.subr.bf16.mxu1 %v2103_v37  ;;  %v2112_v49 = vld [vmem:[%s2764_s4 + $0xa0] sm:$0xff]   ;;  %v2116_v53 = vld [vmem:[%s2764_s4 + $0xa8] sm:$0xff]   ;;  %v2106_v55 = vld [vmem:[%s2764_s4 + $0x110] sm:$0xff]  }
  0x23   :  { %735 = vperm.xlu1 %2064, %v720_v14   ;;  %v2119_v57 = vld [vmem:[%s2764_s4 + $0xf0] sm:$0xff]   ;;  %v2109_v62 = vld [vmem:[%s2764_s4 + $0x158] sm:$0xff]   ;;  %v2113_v4 = vld [vmem:[%s2764_s4 + $0x160] sm:$0xff]   ;;  %v680_v14 = vcvt.s32.f32 %v2381_v17 }
  0x24   :  { %692 = vperm.xlu0 %2066, %v2340_v3   ;;  %1819 = vmatpush3.bf16.msra.mxu0 %v2086_v19  ;;  %v2120_v60 = vld [vmem:[%s2764_s4 + $0xb0] sm:$0xff]   ;;  %v2110_v63 = vld [vmem:[%s2764_s4 + $0x118] sm:$0xff]   ;;  %v2114_v11 = vld [vmem:[%s2764_s4 + $0x120] sm:$0xff]   ;;  %v2260_v19 = vmov 0.0  }
  0x25   :  { %1820 = vmatprep.subr.bf16.mxu0 %v2087_v20  ;;  %1839 = vmatpush3.bf16.msra.mxu1 %v2104_v38  ;;  %v2124_v3 = vld [vmem:[%s2764_s4 + $0xb8] sm:$0xff]   ;;  %v47_v8 = vld [vmem:[%s2760_s0 + $0x10] sm:$0xff]  ;;  %v2117_v13 = vld [vmem:[%s2764_s4 + $0x168] sm:$0xff]   ;;  %v682_v20 = vcvt.s32.f32 %v2442_v36 }
  0x26   :  { %1840 = vmatprep.subr.bf16.mxu1 %v2107_v42  ;;  %v48_v5 = vld [vmem:[%s2760_s0 + $0x18] sm:$0xff]  ;;  %v53_v1 = vpack.c.bf16 %v47_v8, %v47_v8  ;;  %v2118_v15 = vld [vmem:[%s2764_s4 + $0x128] sm:$0xff]   ;;  %v2130_v16 = vld [vmem:[%s2765_s5] sm:$0xff]  }
  0x27   :  { %2067 = vset.pattern.permute.xlu1 %v2257_v0  ;;  %v54_v7 = vpack.c.bf16 %v48_v5, %v48_v5  ;;  %v49_v24 = vld [vmem:[%s2760_s0 + $0x20] sm:$0xff]  ;;  %v2128_v27 = vld [vmem:[%s2762_s2 + $0x8] sm:$0xff]   ;;  %v2129_v28 = vld [vmem:[%s2762_s2 + $0x10] ss:$0 sps:$4 sm:$0x11]  }
  0x28   :  { %701 = vperm.xlu0 %2066, %v2381_v17   ;;  %698 = vperm.xlu1 %2067, %v2387_v18   ;;  %v2121_v18 = vld [vmem:[%s2764_s4 + $0x170] sm:$0xff]   ;;  %v2131_v17 = vld [vmem:[%s2765_s5 + $0x8] sm:$0xff]   ;;  %v55_v26 = vpack.c.bf16 %v49_v24, %v49_v24 }
  0x29   :  { %1821 = vmatpush3.bf16.msra.mxu0 %v2088_v22  ;;  %1841 = vmatpush3.bf16.msra.mxu1 %v2108_v43  ;;  %v2125_v22 = vld [vmem:[%s2764_s4 + $0x178] sm:$0xff]  }
  0x2a   :  { %1822 = vmatprep.subr.bf16.mxu0 %v2089_v23  ;;  %1842 = vmatprep.subr.bf16.mxu1 %v2111_v48  ;;  %v2126_v23 = vld [vmem:[%s2764_s4 + $0x138] sm:$0xff]  }
  0x2b   :  { %513 = vmatprep.mubr.bf16.mxu1 %v54_v7 }
  0x2c   :  { %704 = vperm.xlu0 %2066, %v2399_v21   ;;  %2068 = vset.pattern.permute.xlu1 %v2258_v9  ;;  %v2122_v21 = vld [vmem:[%s2764_s4 + $0x130] sm:$0xff]  }
  0x2d   :  { %738 = vperm.xlu1 %2068, %v721_v25   ;;  %1823 = vmatpush3.bf16.msra.mxu0 %v2090_v30  ;;  %v2127_v25 = vld [vmem:[%s2762_s2] sm:$0xff]   ;;  %v2132_v30 = vld [vmem:[%s2765_s5 + $0x10] sm:$0xff]   ;;  %s2265_s2 = smov [#allocation6]  }
  0x2e   :  { %1824 = vmatprep.subr.bf16.mxu0 %v2091_v34  ;;  %1843 = vmatpush3.bf16.msra.mxu1 %v2112_v49  ;;  %v2584_v34 = vand.u32 127, %v683_v33  ;;  %s1700_s17 = sshll.u32 %s2265_s2, 4  ;;  %s1701_s17 = int_to_ptr.vmem [resolvable:$true] %s1700_s17 }
  0x2f   :  { %1844 = vmatprep.subr.bf16.mxu1 %v2115_v52  ;;  %v2133_v52 = vld [vmem:[%s2765_s5 + $0x18] sm:$0xff]  }
  0x30   :  { %2070 = vset.pattern.permute.xlu0 %v2258_v9 }
  0x31   :  { %744 = vperm.xlu0 %2070, %v723_v31   ;;  %741 = vperm.xlu1 %2068, %v722_v29   ;;  %v812_v29 = vsel %vm810_vm0, %v2129_v28, 0 }
  0x32   :  { %1825 = vmatpush3.bf16.msra.mxu0 %v2092_v35  ;;  %1845 = vmatpush3.bf16.msra.mxu1 %v2116_v53 }
  0x33   :  { %1826 = vmatprep.subr.bf16.mxu0 %v2093_v39  ;;  %1846 = vmatprep.subr.bf16.mxu1 %v2119_v57 }
  0x35   :  { %2069 = vset.pattern.permute.xlu1 %v2257_v0  ;;  %2073 = vset.pattern.permute.xlu0 %v2259_v58  ;;  %v2123_v0 = vld [vmem:[%s2764_s4 + $0xf8] sm:$0xff]  }
  0x36   :  { %707 = vperm.xlu1 %2069, %v2442_v36   ;;  %1827 = vmatpush3.bf16.msra.mxu0 %v2094_v40 }
  0x37   :  { %1856 = vmatprep.subr.bf16.mxu0 %v2097_v45  ;;  %1847 = vmatpush3.bf16.msra.mxu1 %v2120_v60 }
  0x38   :  { %886 = vperm.xlu0 %2073, %v676_v59   ;;  %1848 = vmatprep.subr.bf16.mxu1 %v2123_v0  ;;  %v2136_v0 = vld [vmem:[%s2765_s5 + $0x30] sm:$0xff]  }
  0x39   :  { %474 = vmatmul.mubr.bf16.vlgmr.msra.gmra.mrb[0].mxu0 %v51_v47 }
  0x3a   :  { %2071 = vset.pattern.permute.xlu1 %v2258_v9  ;;  %1857 = vmatpush3.bf16.msra.mxu0 %v2098_v46  ;;  %v50_v9 = vld [vmem:[%s2760_s0 + $0x28] sm:$0xff] }
  0x3b   :  { %747 = vperm.xlu1 %2071, %v724_v44   ;;  %1858 = vmatprep.subr.bf16.mxu0 %v2101_v50  ;;  %v56_v12 = vpack.c.bf16 %v50_v9, %v50_v9 }
  0x3c   :  { %1849 = vmatpush3.bf16.msra.mxu1 %v2124_v3  ;;  %901 = vperm.xlu0 %2073, %v679_v2   ;;  %v2137_v2 = vld [vmem:[%s2765_s5 + $0x38] sm:$0xff]   ;;  %v2262_v3 = vmov 0.0|0.0  }
  0x3d   :  { %553 = vmatprep.mubr.bf16.mxu0 %v56_v12  ;;  %1942 = vmatprep.subr.bf16.mxu1 %v2260_v19 }
  0x3e   :  { %1859 = vmatpush3.bf16.msra.mxu0 %v2102_v51 }
  0x3f   :  { %2072 = vset.pattern.permute.xlu1 %v2259_v58  ;;  %1860 = vmatprep.subr.bf16.mxu0 %v2105_v54 }
  0x40   :  { %881 = vperm.xlu1 %2072, %v675_v56   ;;  %514 = vmatmul.mubr.bf16.vlgmr.msra.gmra.mrb[0].mxu1 %v53_v1 }
  0x41   :  { %911 = vperm.xlu0 %2073, %v681_v10   ;;  %1943 = vmatpush3.bf16.msra.mxu1 %v2130_v16  ;;  %v2653_v16 = vld [vmem:[%s2763_s3 + $0x2] ss:$0 sm:$0xff] }
  0x42   :  { %1861 = vmatpush3.bf16.msra.mxu0 %v2106_v55  ;;  %1944 = vmatprep.subr.bf16.mxu1 %v2260_v19 }
  0x43   :  { %1862 = vmatprep.subr.bf16.mxu0 %v2109_v62  ;;  %v2134_v62 = vld [vmem:[%s2765_s5 + $0x20] sm:$0xff]  }
  0x44   :  { %891 = vperm.xlu1 %2072, %v677_v61  }
  0x45   :  { %1945 = vmatpush3.bf16.msra.mxu1 %v2131_v17  ;;  %v2667_v17 = vld [vmem:[%s2763_s3 + $0x4] ss:$0 sm:$0xff] }
  0x46   :  { %1863 = vmatpush3.bf16.msra.mxu0 %v2110_v63  ;;  %1946 = vmatprep.subr.bf16.mxu1 %v2260_v19  ;;  %v2135_v63 = vld [vmem:[%s2765_s5 + $0x28] sm:$0xff]  }
  0x47   :  { %1864 = vmatprep.subr.bf16.mxu0 %v2113_v4 }
  0x48   :  { %896 = vperm.xlu1 %2072, %v678_v6  }
  0x49   :  { %1947 = vmatpush3.bf16.msra.mxu1 %v2132_v30 }
  0x4a   :  { %1865 = vmatpush3.bf16.msra.mxu0 %v2114_v11  ;;  %1948 = vmatprep.subr.bf16.mxu1 %v2260_v19 }
  0x4b   :  { %1866 = vmatprep.subr.bf16.mxu0 %v2117_v13  ;;  %v2639_v13 = vld [vmem:[%s2763_s3] ss:$0 sm:$0xff] }
  0x4c   :  { %906 = vperm.xlu1 %2072, %v680_v14   ;;  %v2644_v14 = vld [vmem:[%s2763_s3 + $0x1] ss:$0 sm:$0xff]  ;;  %1013 = vrot.lane.b32.xlu0 %v2639_v13, %s2255_s15 }
  0x4d   :  { %1949 = vmatpush3.bf16.msra.mxu1 %v2133_v52 }
  0x4e   :  { %1867 = vmatpush3.bf16.msra.mxu0 %v2118_v15  ;;  %1950 = vmatprep.subr.bf16.mxu1 %v2260_v19 }
  0x4f   :  { %1868 = vmatprep.subr.bf16.mxu0 %v2121_v18  ;;  %v2658_v18 = vld [vmem:[%s2763_s3 + $0x3] ss:$0 sm:$0xff] }
  0x50   :  { %916 = vperm.xlu1 %2072, %v682_v20   ;;  %1037 = vrot.lane.b32.xlu0 %v2653_v16, %s2255_s15 }
  0x51   :  { %1951 = vmatpush3.bf16.msra.mxu1 %v2134_v62 }
  0x52   :  { %1869 = vmatpush3.bf16.msra.mxu0 %v2122_v21  ;;  %1952 = vmatprep.subr.bf16.mxu1 %v2260_v19 }
  0x53   :  { %1870 = vmatprep.subr.bf16.mxu0 %v2125_v22 }
  0x54   :  { %1025 = vrot.lane.b32.xlu1 %v2644_v14, %s2255_s15  ;;  %1061 = vrot.lane.b32.xlu0 %v2667_v17, %s2255_s15 }
  0x55   :  { %1953 = vmatpush3.bf16.msra.mxu1 %v2135_v63 }
  0x56   :  { %1871 = vmatpush3.bf16.msra.mxu0 %v2126_v23  ;;  %1954 = vmatprep.subr.bf16.mxu1 %v2260_v19 }
  0x57   :  { %1962 = vmatprep.subr.bf16.mxu0 %v2127_v25 }
  0x58   :  { %1049 = vrot.lane.b32.xlu1 %v2658_v18, %s2255_s15 }
  0x59   :  { %554 = vmatmul.mubr.bf16.vlgmr.msra.gmra.mrb[4].mxu0 %v55_v26  ;;  %1955 = vmatpush3.bf16.msra.mxu1 %v2136_v0 }
  0x5a   :  { %1963 = vmatpush3.bf16.msra.mxu0 %v2127_v25  ;;  %1956 = vmatprep.subr.bf16.mxu1 %v2260_v19 }
  0x5b   :  { %1964 = vmatprep.subr.bf16.mxu0 %v2128_v27 }
  0x5d   :  { %1957 = vmatpush3.bf16.msra.mxu1 %v2137_v2  ;;  %v2138_v2 = vld [vmem:[#allocation2 + $0x80] sm:$0xff]  }
  0x5e   :  { %1965 = vmatpush3.bf16.msra.mxu0 %v2128_v27  ;;  %2035 = vmatprep.subr.bf16.mxu1 %v2262_v3 }
  0x5f   :  { %2047 = vmatprep.subr.msk.bf16.mxu0 %vm810_vm0, %v2129_v28 }
  0x62   :  { %1967 = vmatpush3.bf16.msra.mxu0 %v812_v29 }
  0x95   :  { %v696_v31 = vpop.permute.xlu1 %695  ;;  %v687_v32 = vpop.permute.xlu0 %686 }
  0x96   :  { %vm709_vm1 = vcmp.eq.s32.totalorder %v2584_v34, %v687_v32  ;;  %vm712_vm9 = vcmp.eq.s32.totalorder %v2584_v34, %v696_v31 }
  0x9a   :  { %v727_v35 = vpop.permute.xlu1 %726  ;;  %v733_v36 = vpop.permute.xlu0 %732 }
  0x9b   :  { %vm749_vm2 = vcmp.eq.s32.totalorder %v2584_v34, %v727_v35  ;;  %vm751_vm7 = vcmp.eq.s32.totalorder %v2584_v34, %v733_v36 }
  0x9c   :  { %vm757_vm3 = vmor %vm709_vm1, %vm749_vm2 }
  0x9d   :  { %v765_v39 = vsel %vm757_vm3, 1.0, %v2260_v19 }
  0x9e   :  { %v730_v37 = vpop.permute.xlu1 %729 }
  0x9f   :  { %vm750_vm4 = vcmp.eq.s32.totalorder %v2584_v34, %v730_v37  ;;  %v690_v38 = vpop.permute.xlu0 %689 }
  0xa0   :  { %vm710_vm5 = vcmp.eq.s32.totalorder %v2584_v34, %v690_v38 }
  0xa1   :  { %vm758_vm6 = vmor %vm710_vm5, %vm750_vm4 }
  0xa2   :  { %v766_v40 = vsel %vm758_vm6, 1.0, %v2260_v19  ;;  %v736_v41 = vpop.permute.xlu1 %735 }
  0xa3   :  { %v773_v42 = vpack.c.bf16 %v766_v40, %v765_v39  ;;  %vm752_vm10 = vcmp.eq.s32.totalorder %v2584_v34, %v736_v41  ;;  %v693_v43 = vpop.permute.xlu0 %692 }
  0xa4   :  { %vm760_vm11 = vmor %vm712_vm9, %vm752_vm10  ;;  %vm711_vm12 = vcmp.eq.s32.totalorder %v2584_v34, %v693_v43 }
  0xa5   :  { %v768_v44 = vsel %vm760_vm11, 1.0, %v2260_v19  ;;  %vm759_vm13 = vmor %vm711_vm12, %vm751_vm7  ;;  %1968 = vmatprep.mubr.msk.bf16.mxu0 %vm797_vm8, %v773_v42  ;;  %vm2261_vm11 = vmmov 0   ;;  %vm932_vm12 = vcmask 523264  }
  0xa6   :  { %v767_v45 = vsel %vm759_vm13, 1.0, %v2260_v19  ;;  %1958 = vmatprep.mubr.msk.bf16.mxu1 %vm2261_vm11, %v2260_v19 }
  0xa7   :  { %v774_v46 = vpack.c.bf16 %v768_v44, %v767_v45  ;;  %v699_v47 = vpop.permute.xlu1 %698  ;;  %v702_v48 = vpop.permute.xlu0 %701 }
  0xa8   :  { %vm713_vm15 = vcmp.eq.s32.totalorder %v2584_v34, %v699_v47  ;;  %vm714_vm2 = vcmp.eq.s32.totalorder %v2584_v34, %v702_v48 }
  0xa9   :  { %1969 = vmatmul.mubr.msk.bf16.vlgmr.msra.gmra.mrb[8].mxu0 %vm797_vm8, %v774_v46 }
  0xab   :  { %v705_v50 = vpop.permute.xlu0 %704 }
  0xac   :  { %v739_v49 = vpop.permute.xlu1 %738  ;;  %vm715_vm5 = vcmp.eq.s32.totalorder %v2584_v34, %v705_v50 }
  0xad   :  { %vm753_vm14 = vcmp.eq.s32.totalorder %v2584_v34, %v739_v49  ;;  %v2676_v49 = vshrl.u32 %v683_v33, 7 }
  0xae   :  { %vm761_vm0 = vmor %vm713_vm15, %vm753_vm14  ;;  %vm1535_vm14 = vcmask 64512  }
  0xaf   :  { %v769_v53 = vsel %vm761_vm0, 1.0, %v2260_v19  ;;  %vm1533_vm13 = vcmp.eq.s32.totalorder %v2584_v34, %v2676_v49 }
  0xb0   :  { %v742_v51 = vpop.permute.xlu1 %741  ;;  %v745_v54 = vpop.permute.xlu0 %744 }
  0xb1   :  { %vm754_vm1 = vcmp.eq.s32.totalorder %v2584_v34, %v742_v51  ;;  %vm755_vm4 = vcmp.eq.s32.totalorder %v2584_v34, %v745_v54 }
  0xb2   :  { %vm762_vm3 = vmor %vm714_vm2, %vm754_vm1 }
  0xb3   :  { %v770_v55 = vsel %vm762_vm3, 1.0, %v2260_v19  ;;  %vm763_vm6 = vmor %vm715_vm5, %vm755_vm4 }
  0xb4   :  { %v775_v56 = vpack.c.bf16 %v770_v55, %v769_v53  ;;  %v771_v59 = vsel %vm763_vm6, 1.0, %v2260_v19 }
  0xb5   :  { %v708_v57 = vpop.permute.xlu1 %707 }
  0xb6   :  { %1972 = vmatprep.mubr.msk.bf16.mxu0 %vm797_vm8, %v775_v56  ;;  %vm716_vm7 = vcmp.eq.s32.totalorder %v2584_v34, %v708_v57 }
  0xb7   :  { %v887_v35 = vpop.permute.xlu0 %886 }
  0xba   :  { %v748_v58 = vpop.permute.xlu1 %747 }
  0xbb   :  { %vm756_vm9 = vcmp.eq.s32.totalorder %v2584_v34, %v748_v58  ;;  %v902_v45 = vpop.permute.xlu0 %901  ;;  %v929_v58 = vmul.u32 8, %v2676_v49 }
  0xbc   :  { %vm764_vm10 = vmor %vm716_vm7, %vm756_vm9 }
  0xbd   :  { %v772_v60 = vsel %vm764_vm10, 1.0, %v2260_v19 }
  0xbe   :  { %v776_v61 = vpack.c.bf16 %v772_v60, %v771_v59  ;;  %v2682_v60 = vld [vmem:[%s2763_s3 + $0x5] ss:$0 sm:$0xff] }
  0xbf   :  { %v882_v28 = vpop.permute.xlu1 %881  ;;  %1073 = vrot.lane.b32.xlu1 %v2682_v60, %s2255_s15 }
  0xc0   :  { %1973 = vmatmul.mubr.msk.bf16.gmra.mrb[12].mxu0 %vm797_vm8, %v776_v61  ;;  %v912_v50 = vpop.permute.xlu0 %911  ;;  %vm930_vm8 = vcmp.eq.s32.totalorder %v2584_v34, %v929_v58 }
  0xc1   :  { %v931_v33 = vsel %vm930_vm8, 1.0, %v2260_v19 }
  0xc3   :  { %v892_v29 = vpop.permute.xlu1 %891 }
  0xc7   :  { %v897_v31 = vpop.permute.xlu1 %896 }
  0xcb   :  { %v907_v44 = vpop.permute.xlu1 %906 }
  0xcf   :  { %v917_v47 = vpop.permute.xlu1 %916 }
 0x10c   :  { %v1828_v4 = vpop.f32.mrb[0].mxu0 }
 0x10d   :  { %v1829_v5 = vpop.f32.mrb[1].mxu0 }
 0x10e   :  { %v1830_v6 = vadd.f32 %v1829_v5, %v1828_v4  ;;  %v1831_v7 = vpop.f32.mrb[2].mxu0  ;;  %v2140_v4 = vld [vmem:[#allocation2 + $0x90] sm:$0xff]   ;;  %v2141_v5 = vld [vmem:[#allocation2 + $0x98] sm:$0xff]  }
 0x10f   :  { %v1832_v8 = vpop.f32.mrb[3].mxu0  ;;  %v2143_v7 = vld [vmem:[#allocation2 + $0xa8] sm:$0xff]  }
 0x110   :  { %v2144_v8 = vld [vmem:[#allocation2 + $0xb0] sm:$0xff]  }
 0x113   :  { %v1850_v9 = vpop.f32.mrb[0].mxu1 }
 0x114   :  { %v1851_v10 = vpop.f32.mrb[1].mxu1 }
 0x115   :  { %v1852_v11 = vadd.f32 %v1851_v10, %v1850_v9  ;;  %v1853_v1 = vpop.f32.mrb[2].mxu1  ;;  %v1014_v10 = vpop.permute.xlu0 %1013 }
 0x116   :  { %v1854_v12 = vpop.f32.mrb[3].mxu1 }
 0x117   :  { %v516_v15 = vadd.f32 %v1852_v11, %v1830_v6  ;;  %v2142_v6 = vld [vmem:[#allocation2 + $0xa0] sm:$0xff]   ;;  %v2145_v12 = vld [vmem:[#allocation2 + $0xb8] sm:$0xff]  }
 0x12c   :  { %v1872_v20 = vpop.f32.mrb[4].mxu0 }
 0x12d   :  { %v1873_v21 = vpop.f32.mrb[5].mxu0 }
 0x12e   :  { %v1874_v22 = vadd.f32 %v1873_v21, %v1872_v20  ;;  %v1875_v23 = vpop.f32.mrb[6].mxu0  ;;  %v2146_v20 = vld [vmem:[#allocation2 + $0x40] sm:$0xff]  }
 0x12f   :  { %v1876_v24 = vpop.f32.mrb[7].mxu0  ;;  %v2147_v21 = vld [vmem:[#allocation2] sm:$0xff]   ;;  %1903 = vmatprep.subr.bf16.mxu0 %v2146_v20  ;;  %v2149_v23 = vld [vmem:[#allocation2 + $0x8] sm:$0xff]  }
 0x130   :  { %v556_v25 = vadd.f32 %v1874_v22, %v516_v15  ;;  %v2148_v22 = vld [vmem:[#allocation2 + $0x48] sm:$0xff]   ;;  %1904 = vmatpush3.bf16.msra.mxu0 %v2147_v21  ;;  %v2150_v24 = vld [vmem:[#allocation2 + $0x50] sm:$0xff]  }
 0x131   :  { %1905 = vmatprep.subr.bf16.mxu0 %v2148_v22 }
 0x132   :  { %2162 = vtanh.f32 %v556_v25  ;;  %v2151_v25 = vld [vmem:[#allocation2 + $0x10] sm:$0xff]  }
 0x134   :  { %1906 = vmatpush3.bf16.msra.mxu0 %v2149_v23 }
 0x135   :  { %1907 = vmatprep.subr.bf16.mxu0 %v2150_v24 }
 0x138   :  { %1908 = vmatpush3.bf16.msra.mxu0 %v2151_v25 }
 0x13c   :  { %v2163_v26 = vpop.eup %2162 }
 0x13d   :  { %v562_v27 = vpack.c.bf16 %v2163_v26, %v2163_v26  ;;  %v2152_v26 = vld [vmem:[#allocation2 + $0x58] sm:$0xff]  }
 0x13e   :  { %1909 = vmatprep.subr.bf16.mxu0 %v2152_v26 }
 0x13f   :  { %1959 = vmatmul.mubr.bf16.vlgmr.msra.gmra.mrb[4].mxu1 %v562_v27  ;;  %v1026_v27 = vpop.permute.xlu1 %1025 }
 0x140   :  { %1992 = vmatprep.mubr.msk.f32.mxu1 %vm2261_vm11, %v2260_v19 }
 0x17c   :  { %v1970_v30 = vpop.f32.mrb[8].mxu0 }
 0x17d   :  { %v848_v32 = vpop.f32.mrb[9].mxu0  ;;  %v921_v37 = vmul.f32 %v1970_v30, %v892_v29  ;;  %v2153_v29 = vld [vmem:[#allocation2 + $0x18] sm:$0xff]  }
 0x17e   :  { %v1971_v36 = vpop.f32.mrb[10].mxu0  ;;  %v919_v40 = vmul.f32 %v882_v28, %v848_v32  ;;  %1910 = vmatpush3.bf16.msra.mxu0 %v2153_v29  ;;  %v2155_v32 = vld [vmem:[#allocation2 + $0x20] sm:$0xff]  }
 0x17f   :  { %v922_v38 = vmul.f32 %v1971_v36, %v897_v31  ;;  %v851_v39 = vpop.f32.mrb[11].mxu0  ;;  %v2154_v31 = vld [vmem:[#allocation2 + $0x60] sm:$0xff]   ;;  %v2157_v36 = vld [vmem:[#allocation2 + $0x28] sm:$0xff]  }
 0x180   :  { %v920_v41 = vmul.f32 %v887_v35, %v851_v39  ;;  %1911 = vmatprep.subr.bf16.mxu0 %v2154_v31  ;;  %v2156_v35 = vld [vmem:[#allocation2 + $0x68] sm:$0xff]  }
 0x181   :  { %v2039_v42 = vpack.c.bf16 %v922_v38, %v921_v37  ;;  %v2158_v37 = vld [vmem:[#allocation2 + $0x70] sm:$0xff]  }
 0x182   :  { %v2036_v43 = vpack.c.bf16 %v920_v41, %v919_v40  ;;  %1912 = vmatpush3.bf16.msra.mxu0 %v2155_v32  ;;  %v2159_v38 = vld [vmem:[#allocation2 + $0x30] sm:$0xff]   ;;  %v1038_v40 = vpop.permute.xlu0 %1037 }
 0x183   :  { %1913 = vmatprep.subr.bf16.mxu0 %v2156_v35 }
 0x184   :  { %2037 = vmatpush3.bf16.msra.mxu1 %v2036_v43  ;;  %v1050_v43 = vpop.permute.xlu1 %1049 }
 0x185   :  { %2038 = vmatprep.subr.bf16.mxu1 %v2262_v3 }
 0x186   :  { %1914 = vmatpush3.bf16.msra.mxu0 %v2157_v36  ;;  %v2263_v36 = vmov 1.0  }
 0x187   :  { %1915 = vmatprep.subr.bf16.mxu0 %v2158_v37 }
 0x188   :  { %2040 = vmatpush3.bf16.msra.mxu1 %v2039_v42 }
 0x189   :  { %2041 = vmatprep.subr.bf16.mxu1 %v2262_v3 }
 0x18a   :  { %1916 = vmatpush3.bf16.msra.mxu0 %v2159_v38 }
 0x193   :  { %v1974_v46 = vpop.f32.mrb[12].mxu0 }
 0x194   :  { %v864_v48 = vpop.f32.mrb[13].mxu0  ;;  %v925_v52 = vmul.f32 %v1974_v46, %v912_v50 }
 0x195   :  { %v1975_v51 = vpop.f32.mrb[14].mxu0  ;;  %v923_v55 = vmul.f32 %v902_v45, %v864_v48  ;;  %v1062_v48 = vpop.permute.xlu0 %1061 }
 0x196   :  { %v926_v53 = vmul.f32 %v1975_v51, %v917_v47  ;;  %v867_v54 = vpop.f32.mrb[15].mxu0 }
 0x197   :  { %v924_v56 = vmul.f32 %v907_v44, %v867_v54  ;;  %v1074_v54 = vpop.permute.xlu1 %1073 }
 0x198   :  { %v2045_v57 = vpack.c.bf16 %v926_v53, %v925_v52  ;;  %v2161_v52 = vld [vmem:[#allocation2 + $0x38] sm:$0xff]  }
 0x199   :  { %v2042_v59 = vpack.c.bf16 %v924_v56, %v923_v55 }
 0x19b   :  { %2043 = vmatpush3.bf16.msra.mxu1 %v2042_v59 }
 0x19c   :  { %2044 = vmatprep.subr.bf16.mxu1 %v2262_v3  ;;  %v2139_v3 = vld [vmem:[#allocation2 + $0x88] sm:$0xff]  }
 0x19f   :  { %2046 = vmatpush3.bf16.msra.mxu1 %v2045_v57 }
 0x1a0   :  { %1995 = vmatprep.subr.bf16.mxu1 %v2260_v19 }
 0x1a2   :  { %1993 = vmatmul.mubr.msk.f32.vlgmr.msra.gmra.mrb[8].mxu1 %vm932_vm12, %v931_v33 }
 0x1a3   :  { %2011 = vmatprep.mubr.msk.bf16.mxu1 %vm2261_vm11, %v2260_v19  ;;  %1996 = vmatpush3.bf16.msra.mxu1 %v2138_v2 }
 0x1a4   :  { %1997 = vmatprep.subr.bf16.mxu1 %v2260_v19 }
 0x1a7   :  { %1998 = vmatpush3.bf16.msra.mxu1 %v2139_v3 }
 0x1a8   :  { %1999 = vmatprep.subr.bf16.mxu1 %v2260_v19 }
 0x1ab   :  { %2000 = vmatpush3.bf16.msra.mxu1 %v2140_v4 }
 0x1ac   :  { %2001 = vmatprep.subr.bf16.mxu1 %v2260_v19 }
 0x1af   :  { %2002 = vmatpush3.bf16.msra.mxu1 %v2141_v5 }
 0x1b0   :  { %2003 = vmatprep.subr.bf16.mxu1 %v2260_v19 }
 0x1b3   :  { %2004 = vmatpush3.bf16.msra.mxu1 %v2142_v6 }
 0x1b4   :  { %2005 = vmatprep.subr.bf16.mxu1 %v2260_v19 }
 0x1b7   :  { %2006 = vmatpush3.bf16.msra.mxu1 %v2143_v7 }
 0x1b8   :  { %2007 = vmatprep.subr.bf16.mxu1 %v2260_v19 }
 0x1bb   :  { %2008 = vmatpush3.bf16.msra.mxu1 %v2144_v8 }
 0x1bc   :  { %2009 = vmatprep.subr.bf16.mxu1 %v2260_v19 }
 0x1bf   :  { %2010 = vmatpush3.bf16.msra.mxu1 %v2145_v12 }
 0x1c0   :  { %2025 = vmatprep.subr.mxu1 %v2260_v19 }
 0x212   :  { %v2693_v61 = vpop.f32.mrb[4].mxu1 }
 0x213   :  { %v1960_v62 = vpop.f32.mrb[5].mxu1  ;;  %v1373_v46 = vmul.f32 %v2693_v61, %v2693_v61 }
 0x214   :  { %v664_v63 = vpop.f32.mrb[6].mxu1 }
 0x215   :  { %v1961_v0 = vpop.f32.mrb[7].mxu1 }
 0x275   :  { %v1002_v9 = vpop.f32.mrb[8].mxu1 }
 0x276   :  { %v1011_v11 = vmul.f32 %v2639_v13, %v1002_v9  ;;  %v1994_v1 = vpop.f32.mrb[9].mxu1 }
 0x277   :  { %v1783_v1 = vld [vmem:[%s2763_s3 + $0x6] ss:$0 sm:$0xff] }
 0x278   :  { %v1016_v15 = vadd.f32 %v1014_v10, %v1011_v11 }
 0x27a   :  { %2164 = vtanh.f32 %v1016_v15 }
 0x284   :  { %v2165_v13 = vpop.eup %2164 }
 0x285   :  { %1087 = vrot.lane.b32.xlu1 %v2165_v13, %s2255_s15  ;;  %v1023_v28 = vmul.f32 %v2165_v13, %v2644_v14 }
 0x287   :  { %v1028_v30 = vadd.f32 %v1026_v27, %v1023_v28 }
 0x289   :  { %2166 = vtanh.f32 %v1028_v30 }
 0x293   :  { %v2167_v39 = vpop.eup %2166 }
 0x294   :  { %v1035_v14 = vmul.f32 %v2167_v39, %v2653_v16  ;;  %v2160_v16 = vld [vmem:[#allocation2 + $0x78] sm:$0xff]  }
 0x295   :  { %1917 = vmatprep.subr.bf16.mxu0 %v2160_v16 }
 0x296   :  { %v1040_v41 = vadd.f32 %v1038_v40, %v1035_v14  ;;  %1918 = vmatpush3.bf16.msra.mxu0 %v2161_v52 }
 0x297   :  { %2015 = vmatprep.subr.mxu0 %v2260_v19 }
 0x298   :  { %2168 = vtanh.f32 %v1040_v41 }
 0x2a2   :  { %v2169_v42 = vpop.eup %2168 }
 0x2a3   :  { %v1047_v44 = vmul.f32 %v2169_v42, %v2658_v18 }
 0x2a5   :  { %v1052_v45 = vadd.f32 %v1050_v43, %v1047_v44 }
 0x2a7   :  { %2170 = vtanh.f32 %v1052_v45 }
 0x2a9   :  { %1374 = vadd.xlane.f32.xlu1 %v1373_v46 }
 0x2b1   :  { %v2171_v47 = vpop.eup %2170 }
 0x2b2   :  { %v1059_v50 = vmul.f32 %v2171_v47, %v2667_v17 }
 0x2b4   :  { %v1064_v51 = vadd.f32 %v1062_v48, %v1059_v50 }
 0x2b6   :  { %2172 = vtanh.f32 %v1064_v51 }
 0x2c0   :  { %v2173_v53 = vpop.eup %2172 }
 0x2c1   :  { %v2074_v18 = vpack.i.bf16 %v2173_v53, %v2169_v42  ;;  %v1071_v17 = vmul.f32 %v2173_v53, %v2682_v60  ;;  %v1385_v60 = vld [vmem:[%s2763_s3 + $0x7] sm:$0x1]  ;;  %s2264_s3 = smov [#allocation5]  }
 0x2c2   :  { %v1386_v5 = vmul.f32 1.442695, %v1385_v60  ;;  %s1690_s16 = sshll.u32 %s2264_s3, 4  ;;  %s1691_s16 = int_to_ptr.vmem [resolvable:$true] %s1690_s16 }
 0x2c3   :  { %2075 = vrot.lane.b32.xlu0 %v2074_v18, %s2255_s15  ;;  %v1076_v58 = vadd.f32 %v1074_v54, %v1071_v17  ;;  %s2204_s18 = scalar_lea.vmem %s1691_s16, 128  ;;  %p2209_p9 = scmp.lt.s32.totalorder %s1691_s16, %s1691_s16 }
 0x2c4   :  { %p2205_p8 = scmp.ne.s32.totalorder %s1691_s16, %s2204_s18  ;;  %p2210_p10 = scmp.lt.s32.totalorder %s2204_s18, %s2204_s18 }
 0x2c5   :  { %2174 = vtanh.f32 %v1076_v58 }
 0x2c6   :  { %2176 = vpow2.f32 %v1386_v5  ;;  %p2211_p11 = por %p2210_p10, %p2209_p9 }
 0x2c8   :  { %p2212_p12 = pnand %p2211_p11, %p2205_p8 }
 0x2cf   :  { %v2175_v63 = vpop.eup %2174 }
 0x2d0   :  { %v2177_v6 = vpop.eup %2176 }
 0x2d1   :  { %2048 = vpush %v2177_v6 }
 0x2f7   :  { %v1088_v55 = vpop.permute.xlu1 %1087 }
 0x2f8   :  { %v1092_v56 = vsel %vm932_vm12, %v2167_v39, %v1088_v55 }
 0x2f9   :  { %v1096_v57 = vpack.c.bf16 %v1092_v56, %v1092_v56 }
 0x2fb   :  { %2012 = vmatmul.mubr.bf16.vlgmr.msra.gmra.mrb[12].mxu1 %v1096_v57 }
 0x2fc   :  { %2027 = vmatprep.mubr.msk.f32.mxu1 %vm2261_vm11, %v2260_v19  ;;  %2026 = vmatpush3.msk.msra.mxu1 %vm1533_vm13, %v2263_v36 }
 0x302   :  { %s2049_s0 = spop %2048 }
 0x303   :  { %v1390_v29 = vstv %s2049_s0 }
 0x335   :  { %v2076_v59 = vpop.permute.xlu0 %2075 }
 0x336   :  { %v2078_v33 = vunpack.i.h.bf16 %v2076_v59  ;;  %v2077_v62 = vunpack.i.l.bf16 %v2076_v59  ;;  %v1375_v25 = vpop.xlane.xlu1 %1374 }
 0x337   :  { %v1376_v27 = vadd.f32 1e-12, %v1375_v25 }
 0x338   :  { %v1090_v0 = vsel %vm932_vm12, %v2175_v63, %v2078_v33  ;;  %v1091_v2 = vsel %vm932_vm12, %v2171_v47, %v2077_v62 }
 0x339   :  { %v1094_v3 = vpack.c.bf16 %v1090_v0, %v1090_v0  ;;  %v1095_v4 = vpack.c.bf16 %v1091_v2, %v1091_v2 }
 0x33b   :  { %1325 = vmatprep.mubr.bf16.mxu0 %v1095_v4 }
 0x33c   :  { %1326 = vmatmul.mubr.bf16.vlgmr.msra.gmra.mrb[16].mxu0 %v1094_v3 }
 0x33d   :  { %2017 = vmatprep.mubr.msk.f32.mxu0 %vm2261_vm11, %v2260_v19 }
 0x3ce   :  { %v1367_v7 = vpop.f32.mrb[12].mxu1 }
 0x3cf   :  { %v2013_v8 = vpop.f32.mrb[13].mxu1 }
 0x3d0   :  { %v1370_v9 = vpop.f32.mrb[14].mxu1 }
 0x3d1   :  { %v2014_v10 = vpop.f32.mrb[15].mxu1 }
 0x40f   :  { %v1919_v11 = vpop.f32.mrb[16].mxu0 }
 0x410   :  { %v1920_v12 = vpop.f32.mrb[17].mxu0 }
 0x411   :  { %v1921_v15 = vadd.f32 %v1920_v12, %v1919_v11  ;;  %v1922_v20 = vpop.f32.mrb[18].mxu0 }
 0x412   :  { %v1923_v21 = vpop.f32.mrb[19].mxu0 }
 0x413   :  { %v1328_v22 = vadd.f32 %v1921_v15, %v1783_v1 }
 0x415   :  { %v1368_v23 = vadd.f32 %v1367_v7, %v1328_v22 }
 0x417   :  { %v1379_v24 = vmul.f32 %v1368_v23, %v1368_v23 }
 0x419   :  { %1380 = vadd.xlane.f32.xlu0 %v1379_v24 }
 0x4a6   :  { %v1381_v26 = vpop.xlane.xlu0 %1380 }
 0x4a7   :  { %v1382_v13 = vadd.f32 1e-12, %v1381_v26 }
 0x4a9   :  { %2178 = vrsqrt.f32 %v1382_v13 }
 0x4aa   :  { %2180 = vrsqrt.f32 %v1376_v27 }
 0x4b3   :  { %v2179_v28 = vpop.eup %2178 }
 0x4b4   :  { %v1384_v30 = vmul.f32 %v2179_v28, %v1368_v23  ;;  %v2181_v31 = vpop.eup %2180 }
 0x4b5   :  { %v1378_v35 = vmul.f32 %v2181_v31, %v2693_v61 }
 0x4b6   :  { %v1392_v32 = vmul.f32 %v1390_v29, %v1384_v30 }
 0x4b8   :  { %2016 = vmatpush3.xpose.msra.mxu0 %v1392_v32 }
 0x4b9   :  { %2020 = vmatprep.subr.mxu0 %v2260_v19 }
 0x4bb   :  { %2018 = vmatmul.mubr.f32.vlgmr.msra.gmra.mrb[20].mxu0 %v1378_v35 }
 0x4bc   :  { %2021 = vmatpush3.xpose.msra.mxu0 %v1378_v35  ;;  %2022 = vmatprep.mubr.msk.f32.mxu0 %vm2261_vm11, %v2260_v19 }
 0x4bd   :  { %2030 = vmatprep.subr.mxu0 %v2260_v19 }
 0x4bf   :  { %2023 = vmatmul.mubr.f32.vlgmr.msra.gmra.mrb[22].mxu0 %v1392_v32 }
 0x4c0   :  { %2032 = vmatprep.mubr.msk.f32.mxu0 %vm2261_vm11, %v2260_v19  ;;  %2031 = vmatpush3.msk.msra.mxu0 %vm1533_vm13, %v2263_v36 }
 0x58e   :  { %v1459_v61 = vpop.f32.mrb[20].mxu0 }
 0x58f   :  { %v2019_v37 = vpop.f32.mrb[21].mxu0  ;;  %2028 = vmatmul.mubr.msk.f32.vlgmr.msra.gmra.mrb[10].mxu1 %vm1535_vm14, %v1459_v61 }
 0x592   :  { %v1529_v38 = vpop.f32.mrb[22].mxu0 }
 0x593   :  { %v2024_v39 = vpop.f32.mrb[23].mxu0  ;;  %2033 = vmatmul.mubr.msk.f32.vlgmr.msra.gmra.mrb[24].mxu0 %vm1535_vm14, %v1529_v38 }
 0x662   :  { %v1605_v40 = vpop.f32.mrb[10].mxu1 }
 0x663   :  { %1609 = vst [vmem:[#allocation5] sm:$0xff] %v1605_v40  ;;  %v2029_v19 = vpop.f32.mrb[11].mxu1 }
 0x664   :  { %2215 = shalt.err (!%p2212_p12)
}
 0x665   :  { %s2216_s21 = scalar_lea.hbm %s2767_s7, 128 }
 0x666   :  { %p2217_p13 = scmp.ne.s32.totalorder %s2767_s7, %s2216_s21  ;;  %p2220_p0 = scmp.lt.u32.totalorder %s2216_s21, %s2767_s7 }
 0x668   :  { %p2222_p1 = pnand %p2220_p0, %p2217_p13 }
 0x66a   :  { %2225 = shalt.err (!%p2222_p1)
}
 0x66b   :  { %1693 = dma.vmem_to_hbm [thread:$0]  %s1691_s16, 128, %s2767_s7, [#allocation4]   ;;  %v1679_v34 = vpop.f32.mrb[24].mxu0 }
 0x66c   :  { %1683 = vst [vmem:[#allocation6] sm:$0xff] %v1679_v34  ;;  %v2034_v49 = vpop.f32.mrb[25].mxu0  ;;  %s2226_s5 = scalar_lea.vmem %s1701_s17, 128  ;;  %p2231_p3 = scmp.lt.s32.totalorder %s1701_s17, %s1701_s17 }
 0x66d   :  { %p2227_p2 = scmp.ne.s32.totalorder %s1701_s17, %s2226_s5  ;;  %p2232_p4 = scmp.lt.s32.totalorder %s2226_s5, %s2226_s5 }
 0x66f   :  { %p2233_p5 = por %p2232_p4, %p2231_p3 }
 0x671   :  { %p2234_p6 = pnand %p2233_p5, %p2227_p2 }
 0x673   :  { %2237 = shalt.err (!%p2234_p6)
}
 0x674   :  { %s2238_s29 = scalar_lea.hbm %s2768_s8, 128 }
 0x675   :  { %p2239_p7 = scmp.ne.s32.totalorder %s2768_s8, %s2238_s29  ;;  %p2242_p8 = scmp.lt.u32.totalorder %s2238_s29, %s2768_s8 }
 0x677   :  { %p2244_p9 = pnand %p2242_p8, %p2239_p7 }
 0x679   :  { %2247 = shalt.err (!%p2244_p9)
}
 0x67a   :  { %1703 = dma.vmem_to_hbm [thread:$0]  %s1701_s17, 128, %s2768_s8, [#allocation7]  }
 0x67b   :  { %2250 = dma.done.wait [#allocation4], 128  }
 0x67c   :  { %2251 = vsyncadd [#allocation4], 4294967168 }
 0x67d   :  { %2252 = dma.done.wait [#allocation7], 128  }
 0x67e   :  { %2253 = vsyncadd [#allocation7], 4294967168 }
 0x67f   :  { %1710 = vsyncpa [#allocation3], 1 }
 0x680   :  { %1711 = vsyncpa [#allocation4], 1 }
 0x681   :  { %1712 = vsyncpa [#allocation7], 1 }

</bundles_post_ra>
